<compile_context>
chip_gen: v5e
topology: v5e:2x2
jax: 0.10.0
libtpu: 0.0.40
codegen_flags: <defaults>
</compile_context>

<pallas_src>
import functools

import jax
import jax.numpy as jnp
from jax import lax
from jax.experimental import pallas as pl
from jax.experimental.pallas import tpu as pltpu


def _basic_block_kernel(*refs, stride, bh, w_out, has_projection):
  """One (batch n, row-block r) tile of the BasicBlock forward pass.

  Ref shapes (leading batch dim squeezed by the BlockSpecs):
    x_ref   : (Hp, Wp, Cin)      f32   zero-padded NHWC input, full image
    w1_ref  : (Cout, 9*Cin)      bf16  conv3x3 weight, K ordered (dy, dx, ci)
    wsc_ref : (Cout, Cin)        bf16  1x1 projection weight (only if proj.)
    s1/b1/s2/b2 : (Cout, 1)      f32   folded eval-mode BatchNorm scale/shift
    o_ref   : (Cout, bh*w_out)   f32   transposed (lane-dense, NCHW-order) tile
  """
  if has_projection:
    x_ref, w1_ref, wsc_ref, s1_ref, b1_ref, s2_ref, b2_ref, o_ref = refs
  else:
    x_ref, w1_ref, s1_ref, b1_ref, s2_ref, b2_ref, o_ref = refs
    wsc_ref = None

  cin = x_ref.shape[-1]
  m = bh * w_out                                   # output pixels in this tile

  # Padded-input rows needed for this block of output rows.
  r = pl.program_id(1)
  row_span = (bh - 1) * stride + 3
  row0 = r * (bh * stride)
  if (bh * stride) % 8 == 0:
    row0 = pl.multiple_of(row0, 8)
  xin = x_ref[pl.ds(row0, row_span), :, :]         # (row_span, Wp, Cin) f32

  # Build the transposed im2col patch (9*Cin, m).  Each tap uses only a
  # leading-dim-merge reshape + a 2-D transpose; the taps are stacked along a
  # new leading axis and collapsed (minor dim preserved), so no lane-axis
  # concatenation or minor-dim-changing reshape is needed.
  taps_t = []                                      # list of (Cin, m) f32
  for dy in range(3):
    for dx in range(3):
      sl = xin[dy:dy + (bh - 1) * stride + 1:stride,
               dx:dx + (w_out - 1) * stride + 1:stride, :]   # (bh, w_out, Cin)
      taps_t.append(sl.reshape(m, cin).T)                    # (Cin, m)
  patch_t = jnp.stack(taps_t, axis=0).reshape(9 * cin, m)    # (9*Cin, m)

  # conv1 as a single MXU matmul: K = 9*Cin, bf16 operands, f32 accumulate.
  out = jnp.dot(w1_ref[...], patch_t.astype(w1_ref.dtype),
                preferred_element_type=jnp.float32)          # (Cout, m) f32

  out = jnp.maximum(out, 0.0)                                # relu
  out = out * s1_ref[...] + b1_ref[...]                      # IC1 BN (eval, folded)
  # TODO(synk): nn.Dropout training-mode stochastic masking not reproduced;
  # eval-mode dropout is the identity, which is what is applied here.

  # Shortcut: the centre tap (dy=1, dx=1) is exactly the stride-s subsample of x.
  xc_t = taps_t[4]                                           # (Cin, m) f32
  if has_projection:
    out = out + jnp.dot(wsc_ref[...], xc_t.astype(wsc_ref.dtype),
                        preferred_element_type=jnp.float32)
  else:
    out = out + xc_t                                         # identity add, exact f32

  out = jnp.maximum(out, 0.0)                                # relu
  out = out * s2_ref[...] + b2_ref[...]                      # IC2 BN (eval, folded)

  o_ref[...] = out                                           # lane-dense store


def _choose_row_block(h_out, w_out):
  """Smallest divisor bh of h_out with bh*w_out a multiple of 128 (lane-dense
  output tiles, MXU free dim >= 128); falls back to the full height."""
  for bh in range(1, h_out):
    if h_out % bh == 0 and (bh * w_out) % 128 == 0:
      return bh
  return h_out


def basic_block_forward(x_nchw, params, stride=1, eps=1e-5,
                        compute_dtype=jnp.bfloat16):
  """Pallas BasicBlock forward. x_nchw: (N, Cin, H, W) f32 -> (N, Cout, Ho, Wo)."""
  N, Cin, H, W = x_nchw.shape
  Cout = params["w1"].shape[0]
  H_out = (H + 2 - 3) // stride + 1
  W_out = (W + 2 - 3) // stride + 1
  Hp, Wp = H + 2, W + 2
  has_projection = (stride != 1) or (Cin != Cout)

  # NCHW -> NHWC (channels on the lane axis) and zero-pad spatial by 1.
  # TODO(synk): the pad + input transpose still run as XLA ops (one extra HBM
  # round trip); fusing the halo/layout change into the kernel would remove it.
  x_nhwc = jnp.transpose(x_nchw, (0, 2, 3, 1)).astype(jnp.float32)
  xp = jnp.pad(x_nhwc, ((0, 0), (1, 1), (1, 1), (0, 0)))

  # conv1 weight OIHW -> (Cout, dy, dx, Cin) -> (Cout, 9*Cin), bf16 for the MXU.
  w1_t = jnp.transpose(params["w1"], (0, 2, 3, 1)).reshape(Cout, 9 * Cin)
  w1_t = w1_t.astype(compute_dtype)

  # Fold eval-mode BatchNorm into per-channel scale/shift (kept in f32).
  def fold_bn(g, b, m, v):
    scale = g / jnp.sqrt(v + eps)
    shift = b - m * scale
    return (scale.reshape(Cout, 1).astype(jnp.float32),
            shift.reshape(Cout, 1).astype(jnp.float32))

  s1, b1 = fold_bn(params["g1"], params["b1"], params["m1"], params["v1"])
  s2, b2 = fold_bn(params["g2"], params["b2"], params["m2"], params["v2"])

  BH = _choose_row_block(H_out, W_out)
  R = H_out // BH
  grid = (N, R)

  in_specs = [
      # Full padded image per batch element; revisited (not re-DMA'd) across r.
      pl.BlockSpec((None, Hp, Wp, Cin), lambda n, r: (n, 0, 0, 0)),
      pl.BlockSpec((Cout, 9 * Cin), lambda n, r: (0, 0)),
  ]
  operands = [xp, w1_t]
  if has_projection:
    wsc_t = params["wsc"].reshape(Cout, Cin).astype(compute_dtype)
    in_specs.append(pl.BlockSpec((Cout, Cin), lambda n, r: (0, 0)))
    operands.append(wsc_t)
  bn_spec = pl.BlockSpec((Cout, 1), lambda n, r: (0, 0))
  in_specs += [bn_spec] * 4
  operands += [s1, b1, s2, b2]

  # Output is written transposed & flattened: (N, Cout, H_out*W_out). The last
  # block dim (BH*W_out) is a multiple of 128 -> lane-dense, unmasked stores,
  # and the layout is already NCHW order.
  out_specs = pl.BlockSpec((None, Cout, BH * W_out), lambda n, r: (n, 0, r))

  kernel = functools.partial(_basic_block_kernel, stride=stride, bh=BH,
                             w_out=W_out, has_projection=has_projection)
  out_flat = pl.pallas_call(
      kernel,
      out_shape=jax.ShapeDtypeStruct((N, Cout, H_out * W_out), jnp.float32),
      grid=grid,
      in_specs=in_specs,
      out_specs=out_specs,
      compiler_params=pltpu.CompilerParams(
          # Both grid axes are independent -> shardable across v7x's 2 TCs.
          dimension_semantics=("parallel", "parallel"),
          # Tiny per-tile footprint; cap well inside v7x's 64 MiB physical VMEM.
          vmem_limit_bytes=32 * 1024 * 1024,
      ),
  )(*operands)

  # Already NCHW order: just un-flatten the spatial dims.
  return out_flat.reshape(N, Cout, H_out, W_out)


def reference_forward(x_nchw, params, stride=1, eps=1e-5,
                      compute_dtype=jnp.float32):
  """Plain-JAX reference (mirrors the PyTorch forward in eval mode).

  With compute_dtype=bfloat16 the conv operands are rounded exactly like the
  Pallas kernel rounds them (f32 accumulation either way), so that comparison
  can use a tight tolerance; compute_dtype=float32 gives the full-precision ref.
  """
  dn = ("NCHW", "OIHW", "NCHW")
  Cin = x_nchw.shape[1]
  Cout = params["w1"].shape[0]
  xc = x_nchw.astype(compute_dtype)

  def bn(t, g, b, m, v):
    g, b, m, v = (a.reshape(1, -1, 1, 1) for a in (g, b, m, v))
    return g * (t - m) / jnp.sqrt(v + eps) + b

  out = lax.conv_general_dilated(
      xc, params["w1"].astype(compute_dtype), (stride, stride),
      ((1, 1), (1, 1)), dimension_numbers=dn,
      preferred_element_type=jnp.float32)
  out = jnp.maximum(out, 0.0)
  out = bn(out, params["g1"], params["b1"], params["m1"], params["v1"])
  if stride != 1 or Cin != Cout:
    sc = lax.conv_general_dilated(
        xc, params["wsc"].astype(compute_dtype), (stride, stride),
        ((0, 0), (0, 0)), dimension_numbers=dn,
        preferred_element_type=jnp.float32)
  else:
    sc = x_nchw.astype(jnp.float32)   # identity shortcut adds the exact input
  out = out + sc
  out = jnp.maximum(out, 0.0)
  out = bn(out, params["g2"], params["b2"], params["m2"], params["v2"])
  return out


def make_params(key, in_planes, planes):
  """Deterministic synthetic parameters (shapes match the PyTorch module)."""
  ks = jax.random.split(key, 12)
  return {
      # conv3x3(in_planes, planes): weight (planes, in_planes, 3, 3), no bias
      "w1": 0.1 * jax.random.normal(ks[0], (planes, in_planes, 3, 3), jnp.float32),
      # shortcut 1x1 conv: weight (planes, in_planes, 1, 1), no bias
      "wsc": 0.1 * jax.random.normal(ks[1], (planes, in_planes, 1, 1), jnp.float32),
      # BatchNorm2d(planes) x2: gamma, beta, running_mean, running_var
      "g1": 1.0 + 0.1 * jax.random.normal(ks[2], (planes,), jnp.float32),
      "b1": 0.1 * jax.random.normal(ks[3], (planes,), jnp.float32),
      "m1": 0.1 * jax.random.normal(ks[4], (planes,), jnp.float32),
      "v1": jax.random.uniform(ks[5], (planes,), jnp.float32, 0.5, 1.5),
      "g2": 1.0 + 0.1 * jax.random.normal(ks[6], (planes,), jnp.float32),
      "b2": 0.1 * jax.random.normal(ks[7], (planes,), jnp.float32),
      "m2": 0.1 * jax.random.normal(ks[8], (planes,), jnp.float32),
      "v2": jax.random.uniform(ks[9], (planes,), jnp.float32, 0.5, 1.5),
  }


if __name__ == "__main__":
  key = jax.random.PRNGKey(0)
  k_x, k_p, k_x2, k_p2 = jax.random.split(key, 4)

  # Case 1: projection shortcut (Cin != Cout), stride=1.
  N, in_planes, planes, H, W, stride = 2, 4, 8, 16, 16, 1
  x = jax.random.normal(k_x, (N, in_planes, H, W), jnp.float32)   # NCHW like PyTorch
  params = make_params(k_p, in_planes, planes)

  out = jax.block_until_ready(basic_block_forward(x, params, stride=stride))
  assert out.shape == (N, planes, H, W), out.shape

  ref_bf16 = jax.block_until_ready(
      reference_forward(x, params, stride=stride, compute_dtype=jnp.bfloat16))
  ref_f32 = jax.block_until_ready(
      reference_forward(x, params, stride=stride, compute_dtype=jnp.float32))
  assert jnp.allclose(out, ref_bf16, rtol=2e-3, atol=2e-3), \
      float(jnp.max(jnp.abs(out - ref_bf16)))
  assert jnp.allclose(out, ref_f32, rtol=1e-1, atol=1e-1), \
      float(jnp.max(jnp.abs(out - ref_f32)))

  # Case 2: identity shortcut (Cin == Cout, stride=1) -> no projection matmul.
  x2 = jax.random.normal(k_x2, (N, planes, H, W), jnp.float32)
  params2 = make_params(k_p2, planes, planes)
  out2 = jax.block_until_ready(basic_block_forward(x2, params2, stride=stride))
  ref2 = jax.block_until_ready(
      reference_forward(x2, params2, stride=stride, compute_dtype=jnp.bfloat16))
  assert out2.shape == (N, planes, H, W), out2.shape
  assert jnp.allclose(out2, ref2, rtol=2e-3, atol=2e-3), \
      float(jnp.max(jnp.abs(out2 - ref2)))

  print("KERNEL_OK")
</pallas_src>

<mosaic_0001>
module attributes {stable_mosaic.version = 11 : i64} {
  func.func @_basic_block_kernel(%arg0: i32, %arg1: i32, %arg2: memref<1x18x18x4xf32, #tpu.memory_space<vmem>>, %arg3: memref<8x36xbf16, #tpu.memory_space<vmem>>, %arg4: memref<8x4xbf16, #tpu.memory_space<vmem>>, %arg5: memref<8x1xf32, #tpu.memory_space<vmem>>, %arg6: memref<8x1xf32, #tpu.memory_space<vmem>>, %arg7: memref<8x1xf32, #tpu.memory_space<vmem>>, %arg8: memref<8x1xf32, #tpu.memory_space<vmem>>, %arg9: memref<1x8x128xf32, #tpu.memory_space<vmem>>) attributes {dimension_semantics = [#tpu.dimension_semantics<parallel>, #tpu.dimension_semantics<parallel>], iteration_bounds = array<i64: 2, 2>, scalar_prefetch = 0 : i64, scratch_operands = 0 : i64, tpu.core_type = #tpu.core_type<tc>, window_params = [{transform_indices = @transform_0, window_bounds = array<i64: 1, 18, 18, 4>}, {pipeline_mode = #tpu.pipeline_mode<synchronous>, transform_indices = @transform_1, window_bounds = array<i64: 8, 36>}, {pipeline_mode = #tpu.pipeline_mode<synchronous>, transform_indices = @transform_2, window_bounds = array<i64: 8, 4>}, {pipeline_mode = #tpu.pipeline_mode<synchronous>, transform_indices = @transform_3, window_bounds = array<i64: 8, 1>}, {pipeline_mode = #tpu.pipeline_mode<synchronous>, transform_indices = @transform_4, window_bounds = array<i64: 8, 1>}, {pipeline_mode = #tpu.pipeline_mode<synchronous>, transform_indices = @transform_5, window_bounds = array<i64: 8, 1>}, {pipeline_mode = #tpu.pipeline_mode<synchronous>, transform_indices = @transform_6, window_bounds = array<i64: 8, 1>}, {transform_indices = @transform_7, window_bounds = array<i64: 1, 8, 128>}]} {
    %c8_i32 = arith.constant 8 : i32
    %0 = arith.muli %arg1, %c8_i32 : i32
    %1 = tpu.assume_multiple %0, 8 : i32
    %c0 = arith.constant 0 : index
    %2 = arith.index_cast %1 : i32 to index
    %c0_0 = arith.constant 0 : index
    %c0_1 = arith.constant 0 : index
    %3 = vector.load %arg2[%c0, %2, %c0_0, %c0_1] : memref<1x18x18x4xf32, #tpu.memory_space<vmem>>, vector<1x10x18x4xf32>
    %4 = vector.shape_cast %3 : vector<1x10x18x4xf32> to vector<10x18x4xf32>
    %5 = vector.extract_strided_slice %4 {offsets = [0, 0, 0], sizes = [8, 16, 4], strides = [1, 1, 1]} : vector<10x18x4xf32> to vector<8x16x4xf32>
    %6 = vector.shape_cast %5 : vector<8x16x4xf32> to vector<128x4xf32>
    %7 = tpu.transpose %6, [1, 0] : vector<128x4xf32> -> vector<4x128xf32>
    %8 = vector.extract_strided_slice %4 {offsets = [0, 1, 0], sizes = [8, 16, 4], strides = [1, 1, 1]} : vector<10x18x4xf32> to vector<8x16x4xf32>
    %9 = vector.shape_cast %8 : vector<8x16x4xf32> to vector<128x4xf32>
    %10 = tpu.transpose %9, [1, 0] : vector<128x4xf32> -> vector<4x128xf32>
    %11 = vector.extract_strided_slice %4 {offsets = [0, 2, 0], sizes = [8, 16, 4], strides = [1, 1, 1]} : vector<10x18x4xf32> to vector<8x16x4xf32>
    %12 = vector.shape_cast %11 : vector<8x16x4xf32> to vector<128x4xf32>
    %13 = tpu.transpose %12, [1, 0] : vector<128x4xf32> -> vector<4x128xf32>
    %14 = vector.extract_strided_slice %4 {offsets = [1, 0, 0], sizes = [8, 16, 4], strides = [1, 1, 1]} : vector<10x18x4xf32> to vector<8x16x4xf32>
    %15 = vector.shape_cast %14 : vector<8x16x4xf32> to vector<128x4xf32>
    %16 = tpu.transpose %15, [1, 0] : vector<128x4xf32> -> vector<4x128xf32>
    %17 = vector.extract_strided_slice %4 {offsets = [1, 1, 0], sizes = [8, 16, 4], strides = [1, 1, 1]} : vector<10x18x4xf32> to vector<8x16x4xf32>
    %18 = vector.shape_cast %17 : vector<8x16x4xf32> to vector<128x4xf32>
    %19 = tpu.transpose %18, [1, 0] : vector<128x4xf32> -> vector<4x128xf32>
    %20 = vector.extract_strided_slice %4 {offsets = [1, 2, 0], sizes = [8, 16, 4], strides = [1, 1, 1]} : vector<10x18x4xf32> to vector<8x16x4xf32>
    %21 = vector.shape_cast %20 : vector<8x16x4xf32> to vector<128x4xf32>
    %22 = tpu.transpose %21, [1, 0] : vector<128x4xf32> -> vector<4x128xf32>
    %23 = vector.extract_strided_slice %4 {offsets = [2, 0, 0], sizes = [8, 16, 4], strides = [1, 1, 1]} : vector<10x18x4xf32> to vector<8x16x4xf32>
    %24 = vector.shape_cast %23 : vector<8x16x4xf32> to vector<128x4xf32>
    %25 = tpu.transpose %24, [1, 0] : vector<128x4xf32> -> vector<4x128xf32>
    %26 = vector.extract_strided_slice %4 {offsets = [2, 1, 0], sizes = [8, 16, 4], strides = [1, 1, 1]} : vector<10x18x4xf32> to vector<8x16x4xf32>
    %27 = vector.shape_cast %26 : vector<8x16x4xf32> to vector<128x4xf32>
    %28 = tpu.transpose %27, [1, 0] : vector<128x4xf32> -> vector<4x128xf32>
    %29 = vector.extract_strided_slice %4 {offsets = [2, 2, 0], sizes = [8, 16, 4], strides = [1, 1, 1]} : vector<10x18x4xf32> to vector<8x16x4xf32>
    %30 = vector.shape_cast %29 : vector<8x16x4xf32> to vector<128x4xf32>
    %31 = tpu.transpose %30, [1, 0] : vector<128x4xf32> -> vector<4x128xf32>
    %32 = vector.shape_cast %7 : vector<4x128xf32> to vector<1x4x128xf32>
    %33 = vector.shape_cast %10 : vector<4x128xf32> to vector<1x4x128xf32>
    %34 = vector.shape_cast %13 : vector<4x128xf32> to vector<1x4x128xf32>
    %35 = vector.shape_cast %16 : vector<4x128xf32> to vector<1x4x128xf32>
    %36 = vector.shape_cast %19 : vector<4x128xf32> to vector<1x4x128xf32>
    %37 = vector.shape_cast %22 : vector<4x128xf32> to vector<1x4x128xf32>
    %38 = vector.shape_cast %25 : vector<4x128xf32> to vector<1x4x128xf32>
    %39 = vector.shape_cast %28 : vector<4x128xf32> to vector<1x4x128xf32>
    %40 = vector.shape_cast %31 : vector<4x128xf32> to vector<1x4x128xf32>
    %41 = tpu.concatenate %32, %33, %34, %35, %36, %37, %38, %39, %40 in 0 : vector<1x4x128xf32>, vector<1x4x128xf32>, vector<1x4x128xf32>, vector<1x4x128xf32>, vector<1x4x128xf32>, vector<1x4x128xf32>, vector<1x4x128xf32>, vector<1x4x128xf32>, vector<1x4x128xf32> -> vector<9x4x128xf32>
    %42 = vector.shape_cast %41 : vector<9x4x128xf32> to vector<36x128xf32>
    %c0_2 = arith.constant 0 : index
    %c0_3 = arith.constant 0 : index
    %43 = vector.load %arg3[%c0_2, %c0_3] : memref<8x36xbf16, #tpu.memory_space<vmem>>, vector<8x36xbf16>
    %44 = arith.truncf %42 : vector<36x128xf32> to vector<36x128xbf16>
    %cst = arith.constant dense<0.000000e+00> : vector<8x128xf32>
    %45 = tpu.matmul %43, %44, %cst {dimension_numbers = #tpu.dot_dimension_numbers<[1], [0], [0], [1], [0, 0, 1, 1], [], []>} : vector<8x36xbf16>, vector<36x128xbf16>, vector<8x128xf32> -> vector<8x128xf32>
    %cst_4 = arith.constant 0.000000e+00 : f32
    %46 = vector.broadcast %cst_4 : f32 to vector<8x128xf32>
    %47 = arith.maximumf %45, %46 : vector<8x128xf32>
    %c0_5 = arith.constant 0 : index
    %c0_6 = arith.constant 0 : index
    %48 = vector.load %arg5[%c0_5, %c0_6] : memref<8x1xf32, #tpu.memory_space<vmem>>, vector<8x1xf32>
    %49 = vector.broadcast %48 : vector<8x1xf32> to vector<8x128xf32>
    %50 = arith.mulf %47, %49 : vector<8x128xf32>
    %c0_7 = arith.constant 0 : index
    %c0_8 = arith.constant 0 : index
    %51 = vector.load %arg6[%c0_7, %c0_8] : memref<8x1xf32, #tpu.memory_space<vmem>>, vector<8x1xf32>
    %52 = vector.broadcast %51 : vector<8x1xf32> to vector<8x128xf32>
    %53 = arith.addf %50, %52 : vector<8x128xf32>
    %c0_9 = arith.constant 0 : index
    %c0_10 = arith.constant 0 : index
    %54 = vector.load %arg4[%c0_9, %c0_10] : memref<8x4xbf16, #tpu.memory_space<vmem>>, vector<8x4xbf16>
    %55 = arith.truncf %19 : vector<4x128xf32> to vector<4x128xbf16>
    %cst_11 = arith.constant dense<0.000000e+00> : vector<8x128xf32>
    %56 = tpu.matmul %54, %55, %cst_11 {dimension_numbers = #tpu.dot_dimension_numbers<[1], [0], [0], [1], [0, 0, 1, 1], [], []>} : vector<8x4xbf16>, vector<4x128xbf16>, vector<8x128xf32> -> vector<8x128xf32>
    %57 = arith.addf %53, %56 : vector<8x128xf32>
    %cst_12 = arith.constant 0.000000e+00 : f32
    %58 = vector.broadcast %cst_12 : f32 to vector<8x128xf32>
    %59 = arith.maximumf %57, %58 : vector<8x128xf32>
    %c0_13 = arith.constant 0 : index
    %c0_14 = arith.constant 0 : index
    %60 = vector.load %arg7[%c0_13, %c0_14] : memref<8x1xf32, #tpu.memory_space<vmem>>, vector<8x1xf32>
    %61 = vector.broadcast %60 : vector<8x1xf32> to vector<8x128xf32>
    %62 = arith.mulf %59, %61 : vector<8x128xf32>
    %c0_15 = arith.constant 0 : index
    %c0_16 = arith.constant 0 : index
    %63 = vector.load %arg8[%c0_15, %c0_16] : memref<8x1xf32, #tpu.memory_space<vmem>>, vector<8x1xf32>
    %64 = vector.broadcast %63 : vector<8x1xf32> to vector<8x128xf32>
    %65 = arith.addf %62, %64 : vector<8x128xf32>
    %c0_17 = arith.constant 0 : index
    %c0_18 = arith.constant 0 : index
    %c0_19 = arith.constant 0 : index
    %66 = vector.load %arg9[%c0_17, %c0_18, %c0_19] : memref<1x8x128xf32, #tpu.memory_space<vmem>>, vector<1x8x128xf32>
    %67 = vector.shape_cast %66 : vector<1x8x128xf32> to vector<8x128xf32>
    %68 = vector.shape_cast %65 : vector<8x128xf32> to vector<1x8x128xf32>
    tpu.vector_store %arg9[%c0_17, %c0_18, %c0_19], %68 {strides = array<i32>} : memref<1x8x128xf32, #tpu.memory_space<vmem>>, vector<1x8x128xf32>,
    return
  }
  func.func @transform_0(%arg0: i32, %arg1: i32) -> (i32, i32, i32, i32) {
    %c0_i32 = arith.constant 0 : i32
    %c0_i32_0 = arith.constant 0 : i32
    %c0_i32_1 = arith.constant 0 : i32
    %c0_i32_2 = arith.constant 0 : i32
    return %arg0, %c0_i32, %c0_i32_0, %c0_i32_1 : i32, i32, i32, i32
  }
  func.func @transform_1(%arg0: i32, %arg1: i32) -> (i32, i32) {
    %c0_i32 = arith.constant 0 : i32
    %c0_i32_0 = arith.constant 0 : i32
    %c0_i32_1 = arith.constant 0 : i32
    return %c0_i32, %c0_i32_0 : i32, i32
  }
  func.func @transform_2(%arg0: i32, %arg1: i32) -> (i32, i32) {
    %c0_i32 = arith.constant 0 : i32
    %c0_i32_0 = arith.constant 0 : i32
    %c0_i32_1 = arith.constant 0 : i32
    return %c0_i32, %c0_i32_0 : i32, i32
  }
  func.func @transform_3(%arg0: i32, %arg1: i32) -> (i32, i32) {
    %c0_i32 = arith.constant 0 : i32
    %c0_i32_0 = arith.constant 0 : i32
    %c0_i32_1 = arith.constant 0 : i32
    return %c0_i32, %c0_i32_0 : i32, i32
  }
  func.func @transform_4(%arg0: i32, %arg1: i32) -> (i32, i32) {
    %c0_i32 = arith.constant 0 : i32
    %c0_i32_0 = arith.constant 0 : i32
    %c0_i32_1 = arith.constant 0 : i32
    return %c0_i32, %c0_i32_0 : i32, i32
  }
  func.func @transform_5(%arg0: i32, %arg1: i32) -> (i32, i32) {
    %c0_i32 = arith.constant 0 : i32
    %c0_i32_0 = arith.constant 0 : i32
    %c0_i32_1 = arith.constant 0 : i32
    return %c0_i32, %c0_i32_0 : i32, i32
  }
  func.func @transform_6(%arg0: i32, %arg1: i32) -> (i32, i32) {
    %c0_i32 = arith.constant 0 : i32
    %c0_i32_0 = arith.constant 0 : i32
    %c0_i32_1 = arith.constant 0 : i32
    return %c0_i32, %c0_i32_0 : i32, i32
  }
  func.func @transform_7(%arg0: i32, %arg1: i32) -> (i32, i32, i32) {
    %c0_i32 = arith.constant 0 : i32
    %c0_i32_0 = arith.constant 0 : i32
    return %arg0, %c0_i32, %arg1 : i32, i32, i32
  }
}

</mosaic_0001>

<bundles_post_ra>
// kernel: tpu_custom_call.1
= control target key start
LH: loop header
LB: loop body
LE: loop exit
PB: predicated region body
PF: predicated region fallthrough
CT: control target
= control target key end

     0   :  { %12 = vsyncpa [#allocation3], 0  ;;  %s1671_s0 = inlined_call_operand.vmem [shape: f32[2,18,18,4], index: 0, kind: input, shape index: {}]   ;;  %s1672_s1 = inlined_call_operand.vmem [shape: bf16[8,36], index: 1, kind: input, shape index: {}]   ;;  %s1673_s2 = inlined_call_operand.vmem [shape: bf16[8,4], index: 2, kind: input, shape index: {}]   ;;  %s1674_s3 = inlined_call_operand.vmem [shape: f32[8,1], index: 3, kind: input, shape index: {}]   ;;  %s1675_s4 = inlined_call_operand.vmem [shape: f32[8,1], index: 4, kind: input, shape index: {}]   ;;  %s1676_s5 = inlined_call_operand.vmem [shape: f32[8,1], index: 5, kind: input, shape index: {}]   ;;  %s1677_s6 = inlined_call_operand.vmem [shape: f32[8,1], index: 6, kind: input, shape index: {}]   ;;  %s1678_s7 = inlined_call_operand.hbm [shape: f32[2,8,256], index: 7, kind: output, shape index: {}]  }
   0x1   :  { %14 = vsyncpa [#allocation3 + $0x1], 0  ;;  %s1220_s24 = smov 0   ;;  %s1222_s25 = smov 0  }
   0x2   :  { %s1224_s26 = smov 0   ;;  %s1226_s27 = smov 0  }
   0x3   :  { %s1228_s28 = smov 0   ;;  %s1230_s29 = smov 0  }
   0x4   :  { %s1232_s30 = smov 0   ;;  %s1234_s8 = smov 0  }
   0x5 LB: > { %s991_s9 = sadd.s32 4294967295, %s1177_s8   ;;  %s992_s10 = sadd.s32 4294967294, %s1177_s8   ;;  %s1177_s8 = sphi %s1234_s8, %s20_s8   ;;  %s1173_s30 = sphi %s1232_s30, %s1690_s30   ;;  %s1169_s29 = sphi %s1230_s29, %s1689_s29   ;;  %s1165_s28 = sphi %s1228_s28, %s1688_s28   ;;  %s1161_s27 = sphi %s1226_s27, %s1687_s27   ;;  %s1157_s26 = sphi %s1224_s26, %s1686_s26   ;;  %s1153_s25 = sphi %s1222_s25, %s1685_s25   ;;  %s1149_s24 = sphi %s1220_s24, %s1684_s24  }
   0x6   : > { %s29_s11 = sadd.s32 1, %s1169_s29  ;;  %s32_s12 = sadd.s32 1, %s1173_s30 }
   0x7   : > { %p30_p0 = scmp.ge.s32.totalorder %s29_s11, 2  ;;  %p203_p1 = scmp.ne.s32.totalorder %s1157_s26, %s1153_s25 }
   0x8   : > { %p204_p2 = scmp.eq.s32.totalorder %s991_s9, 3  ;;  %p209_p5 = scmp.ne.s32.totalorder %s1153_s25, %s1149_s24 }
   0x9   : > { %s1692_s11 = smov (%p30_p0, %s29_s11), 0  ;;  %s1694_s12 = smov (!%p30_p0, %s32_s12), %s1173_s30 }
   0xa   : > { %1680 = sst [smem:[#allocation5_spill]] %s1692_s11  ;;  %s189_s13 = ssub.s32 %s1169_s29, %s1692_s11 }
   0xb   : > { %p1271_p3 = por %p204_p2, %p203_p1  ;;  %p34_p4 = scmp.ge.s32.totalorder %s1694_s12, 2 }
   0xc   : > { %p210_p6 = scmp.eq.s32.totalorder %s992_s10, 3  ;;  %p995_p7 = scmp.ge.s32.totalorder %s1177_s8, 1 }
   0xd   : > { %s1696_s12 = smov (%p34_p4, %s1694_s12), 0  ;;  %p254_p9 = scmp.lt.s32.totalorder %s1177_s8, 5 }
   0xe   : > { %p1280_p8 = por %p210_p6, %p209_p5  ;;  %s188_s16 = ssub.s32 %s1173_s30, %s1696_s12 }
   0xf   : > { %s193_s17 = sadd.s32 1, %s1157_s26  ;;  %s190_s18 = sor.u32 %s189_s13, %s188_s16 }
  0x10   : > { %p255_p10 = pnand %p995_p7, %p254_p9  ;;  %p191_p11 = scmp.eq.s32.totalorder %s190_s18, 0 }
  0x11   : > { %p286_p12 = scmp.lt.s32.totalorder (!%p255_p10), %s1165_s28, 1  ;;  %s999_s21 = smul.u32 (!%p255_p10), 192, %s1161_s27 }
  0x12   : > { %s1289_s19 = scalar_select %p191_p11, %s1157_s26, %s193_s17  }
  0x13   : > { %258 = sbr.rel (%p255_p10) target bundleno = 647 (0x287), region = 48  ;;  %s1003_s13 = sshll.u32 (!%p255_p10), %s1165_s28, 1 }
  0x14   : > { %s283_s16 = sand.u32 (!%p255_p10), 1, %s1153_s25   ;;  %s910_s17 = sadd.s32 (!%p255_p10), %s1161_s27, %s1003_s13 }
  0x15   : > { %s996_s18 = sshll.u32 (!%p255_p10), %s283_s16, 3  ;;  %s900_s27 = scalar_lea.sflag (!%p255_p10), [#allocation3], %s283_s16 }
  0x16   : > { %s285_s9 = scalar_lea.vmem (!%p255_p10), [#allocation2], %s996_s18  ;;  %s1103_s18 = scalar_lea.hbm (!%p255_p10), %s1678_s7, 32 }
  0x18   : > { %s287_s20 = scalar_select %p286_p12, %s1165_s28, 1  ;;  %vm381_vm0 = vcmask 1046528   ;;  %vm470_vm1 = vcmask 1045504   ;;  %vm828_vm2 = vcmask 1041408   ;;  %vm862_vm3 = vcmask 31744  }
  0x19   : > { %vm824_vm4 = vcmask 293888  }
  0x1a   : > { %s1007_s22 = smul.u32 432, %s287_s20  ;;  %s1004_s20 = sshll.u32 %s910_s17, 3 }
  0x1b   : > { %s912_s23 = scalar_lea.hbm %s1678_s7, %s1004_s20 }
  0x1c   : > { %s290_s10 = scalar_lea.vmem %s1671_s0, %s1007_s22  ;;  %s916_s28 = sshll.u32 %s912_s23, 4  ;;  %s917_s28 = int_to_ptr.hbm [resolvable:$true] %s916_s28 }
  0x1d   : > { %s1297_s11 = scalar_lea.vmem %s290_s10, %s999_s21  ;;  %s914_s10 = sshll.u32 %s285_s9, 4  ;;  %s915_s10 = int_to_ptr.vmem [resolvable:$true] %s914_s10 }
  0x1e   : > { %v295_v0 = vld [vmem:[%s1297_s11] sm:$0xff]  ;;  %v296_v1 = vld [vmem:[%s1297_s11 + $0x8] sm:$0xff]  ;;  %v297_v5 = vld [vmem:[%s1297_s11 + $0x10] sm:$0x3] }
  0x1f   : > { %325 = vxpose.xlu0.b32.start [1/16] (narrow) %v295_v0, 8  ;;  %v382_v2 = vrot.slane %v295_v0, 1  ;;  %v471_v3 = vrot.slane %v295_v0, 2  ;;  %v383_v4 = vrot.slane %v296_v1, 1  ;;  %v472_v6 = vrot.slane %v296_v1, 2  ;;  %v1306_v12 = vld [vmem:[%s1297_s11 + $0x20] sm:$0xff] }
  0x20   : > { %v385_v9 = vrot.slane %v297_v5, 1  ;;  %v474_v10 = vrot.slane %v297_v5, 2  ;;  %v1310_v14 = vld [vmem:[%s1297_s11 + $0x18] sm:$0xff]  ;;  %v388_v16 = vrot.slane %v1306_v12, 1  ;;  %v477_v18 = vrot.slane %v1306_v12, 2  ;;  %v1338_v27 = vld [vmem:[%s1297_s11 + $0x30] sm:$0xff] }
  0x21   : > { %v384_v7 = vsel %vm381_vm0, %v382_v2, %v383_v4  ;;  %v473_v8 = vsel %vm470_vm1, %v471_v3, %v472_v6  ;;  %v387_v15 = vrot.slane %v1310_v14, 1  ;;  %v476_v17 = vrot.slane %v1310_v14, 2  ;;  %v300_v20 = vld [vmem:[%s1297_s11 + $0x28] sm:$0x3]  ;;  %v1331_v25 = vld [vmem:[%s1297_s11 + $0x38] sm:$0xff]  ;;  %v1360_v38 = vld [vmem:[%s1297_s11 + $0x50] sm:$0xff] }
  0x22   : > { %438 = vxpose.xlu1.b32.start [1/16] (narrow) %v384_v7, 8  ;;  %527 = vxpose.xlu2.b32.start [1/16] (narrow) %v473_v8, 8  ;;  %v386_v11 = vsel %vm381_vm0, %v383_v4, %v385_v9  ;;  %v475_v13 = vsel %vm470_vm1, %v472_v6, %v474_v10  ;;  %v390_v22 = vrot.slane %v300_v20, 1  ;;  %v479_v23 = vrot.slane %v300_v20, 2  ;;  %v303_v33 = vld [vmem:[%s1297_s11 + $0x40] sm:$0x3] }
  0x23   : > { %v1318_v19 = vsel %vm381_vm0, %v387_v15, %v388_v16  ;;  %v1322_v21 = vsel %vm470_vm1, %v476_v17, %v477_v18  ;;  %v392_v28 = vrot.slane %v1338_v27, 1  ;;  %v393_v29 = vrot.slane %v1331_v25, 1  ;;  %v1367_v40 = vld [vmem:[%s1297_s11 + $0x48] sm:$0xff]  ;;  %v306_v46 = vld [vmem:[%s1297_s11 + $0x58] sm:$0x3]  ;;  %v1396_v53 = vld [vmem:[%s1297_s11 + $0x60] sm:$0xff] }
  0x24   : > { %v1328_v24 = vsel %vm381_vm0, %v388_v16, %v390_v22  ;;  %v1334_v26 = vsel %vm470_vm1, %v477_v18, %v479_v23  ;;  %v481_v30 = vrot.slane %v1338_v27, 2  ;;  %v482_v31 = vrot.slane %v1331_v25, 2  ;;  %v1389_v51 = vld [vmem:[%s1297_s11 + $0x68] sm:$0xff]  ;;  %v309_v59 = vld [vmem:[%s1297_s11 + $0x70] sm:$0x3]  ;;  %v1418_v0 = vld [vmem:[%s1297_s11 + $0x80] sm:$0xff] }
  0x25   : > { %v1347_v32 = vsel %vm381_vm0, %v392_v28, %v393_v29  ;;  %v395_v35 = vrot.slane %v303_v33, 1  ;;  %v484_v36 = vrot.slane %v303_v33, 2  ;;  %v397_v41 = vrot.slane %v1367_v40, 1  ;;  %v1425_v2 = vld [vmem:[%s1297_s11 + $0x78] sm:$0xff]  ;;  %v312_v8 = vld [vmem:[%s1297_s11 + $0x88] sm:$0x3] }
  0x26   : > { %v1351_v34 = vsel %vm470_vm1, %v481_v30, %v482_v31  ;;  %v398_v42 = vrot.slane %v1360_v38, 1  ;;  %v486_v43 = vrot.slane %v1367_v40, 2  ;;  %v487_v44 = vrot.slane %v1360_v38, 2  ;;  %v1447_v15 = vld [vmem:[%s1297_s11 + $0x98] sm:$0xff]  ;;  %v1454_v17 = vld [vmem:[%s1297_s11 + $0x90] sm:$0xff] }
  0x27   : > { %326 = vxpose.xlu0.b32.cont [2/16] (narrow) %v296_v1, 8  ;;  %v1357_v37 = vsel %vm381_vm0, %v393_v29, %v395_v35  ;;  %v1363_v39 = vsel %vm470_vm1, %v482_v31, %v484_v36  ;;  %v400_v48 = vrot.slane %v306_v46, 1  ;;  %v489_v49 = vrot.slane %v306_v46, 2  ;;  %v315_v29 = vld [vmem:[%s1297_s11 + $0xa0] sm:$0x3]  ;;  %v1476_v36 = vld [vmem:[%s1297_s11 + $0xb0] sm:$0xff] }
  0x28   : > { %v1376_v45 = vsel %vm381_vm0, %v397_v41, %v398_v42  ;;  %v1380_v47 = vsel %vm470_vm1, %v486_v43, %v487_v44  ;;  %v402_v54 = vrot.slane %v1396_v53, 1  ;;  %v403_v55 = vrot.slane %v1389_v51, 1 }
  0x29   : > { %v1386_v50 = vsel %vm381_vm0, %v398_v42, %v400_v48  ;;  %v1392_v52 = vsel %vm470_vm1, %v487_v44, %v489_v49  ;;  %v491_v56 = vrot.slane %v1396_v53, 2  ;;  %v492_v57 = vrot.slane %v1389_v51, 2  ;;  %v1483_v42 = vld [vmem:[%s1297_s11 + $0xa8] sm:$0xff] }
  0x2a   : > { %439 = vxpose.xlu1.b32.cont [2/16] (narrow) %v386_v11, 8  ;;  %528 = vxpose.xlu2.b32.cont [2/16] (narrow) %v475_v13, 8  ;;  %v1405_v58 = vsel %vm381_vm0, %v402_v54, %v403_v55  ;;  %v405_v61 = vrot.slane %v309_v59, 1  ;;  %v494_v62 = vrot.slane %v309_v59, 2  ;;  %v407_v3 = vrot.slane %v1425_v2, 1 }
  0x2b   : > { %v1409_v60 = vsel %vm470_vm1, %v491_v56, %v492_v57  ;;  %v408_v4 = vrot.slane %v1418_v0, 1  ;;  %v496_v5 = vrot.slane %v1425_v2, 2  ;;  %v497_v6 = vrot.slane %v1418_v0, 2  ;;  %v318_v54 = vld [vmem:[%s1297_s11 + $0xb8] sm:$0x3] }
  0x2c   : > { %v1415_v63 = vsel %vm381_vm0, %v403_v55, %v405_v61  ;;  %v1421_v1 = vsel %vm470_vm1, %v492_v57, %v494_v62  ;;  %v410_v10 = vrot.slane %v312_v8, 1  ;;  %v499_v11 = vrot.slane %v312_v8, 2 }
  0x2d   : > { %v1434_v7 = vsel %vm381_vm0, %v407_v3, %v408_v4  ;;  %v1438_v9 = vsel %vm470_vm1, %v496_v5, %v497_v6  ;;  %v412_v18 = vrot.slane %v1454_v17, 1  ;;  %v413_v20 = vrot.slane %v1447_v15, 1  ;;  %v321_v3 = vld [vmem:[%s1297_s11 + $0xd0] sm:$0x3] }
  0x2e   : > { %v1444_v13 = vsel %vm381_vm0, %v408_v4, %v410_v10  ;;  %v1450_v16 = vsel %vm470_vm1, %v497_v6, %v499_v11  ;;  %v501_v22 = vrot.slane %v1454_v17, 2  ;;  %v502_v23 = vrot.slane %v1447_v15, 2  ;;  %v860_v11 = vld [vmem:[%s1673_s2] sm:$0xf] }
  0x2f   : > { %327 = vxpose.xlu0.b32.cont [3/16] (narrow) %v1310_v14, 8  ;;  %v1463_v28 = vsel %vm381_vm0, %v412_v18, %v413_v20  ;;  %v415_v31 = vrot.slane %v315_v29, 1  ;;  %v504_v33 = vrot.slane %v315_v29, 2  ;;  %v417_v43 = vrot.slane %v1483_v42, 1 }
  0x30   : > { %v1467_v30 = vsel %vm470_vm1, %v501_v22, %v502_v23  ;;  %v418_v44 = vrot.slane %v1476_v36, 1  ;;  %v506_v46 = vrot.slane %v1483_v42, 2  ;;  %v507_v48 = vrot.slane %v1476_v36, 2 }
  0x31   : > { %v1473_v35 = vsel %vm381_vm0, %v413_v20, %v415_v31  ;;  %v1479_v41 = vsel %vm470_vm1, %v502_v23, %v504_v33  ;;  %v420_v56 = vrot.slane %v318_v54, 1  ;;  %v509_v57 = vrot.slane %v318_v54, 2  ;;  %v785_v31 = vld [vmem:[%s1672_s1] sm:$0xf] }
  0x32   : > { %440 = vxpose.xlu1.b32.cont [3/16] (narrow) %v1318_v19, 8  ;;  %529 = vxpose.xlu2.b32.cont [3/16] (narrow) %v1322_v21, 8  ;;  %v1492_v49 = vsel %vm381_vm0, %v417_v43, %v418_v44  ;;  %v1496_v55 = vsel %vm470_vm1, %v506_v46, %v507_v48  ;;  %v597_v5 = vrot.slane %v321_v3, 1  ;;  %v636_v6 = vrot.slane %v321_v3, 2 }
  0x33   : > { %v1502_v59 = vsel %vm381_vm0, %v418_v44, %v420_v56  ;;  %v1505_v61 = vsel %vm470_vm1, %v507_v48, %v509_v57  ;;  %v1179_v33 = vmov 0  }
  0x37   : > { %328 = vxpose.xlu0.b32.cont [4/16] (narrow) %v1306_v12, 8 }
  0x3a   : > { %441 = vxpose.xlu1.b32.cont [4/16] (narrow) %v1328_v24, 8  ;;  %530 = vxpose.xlu2.b32.cont [4/16] (narrow) %v1334_v26, 8 }
  0x3f   : > { %329 = vxpose.xlu0.b32.cont [5/16] (narrow) %v1338_v27, 8 }
  0x42   : > { %442 = vxpose.xlu1.b32.cont [5/16] (narrow) %v1347_v32, 8  ;;  %531 = vxpose.xlu2.b32.cont [5/16] (narrow) %v1351_v34, 8 }
  0x47   : > { %330 = vxpose.xlu0.b32.cont [6/16] (narrow) %v1331_v25, 8 }
  0x4a   : > { %443 = vxpose.xlu1.b32.cont [6/16] (narrow) %v1357_v37, 8  ;;  %532 = vxpose.xlu2.b32.cont [6/16] (narrow) %v1363_v39, 8 }
  0x4f   : > { %331 = vxpose.xlu0.b32.cont [7/16] (narrow) %v1367_v40, 8 }
  0x52   : > { %444 = vxpose.xlu1.b32.cont [7/16] (narrow) %v1376_v45, 8  ;;  %533 = vxpose.xlu2.b32.cont [7/16] (narrow) %v1380_v47, 8 }
  0x57   : > { %332 = vxpose.xlu0.b32.cont [8/16] (narrow) %v1360_v38, 8 }
  0x5a   : > { %445 = vxpose.xlu1.b32.cont [8/16] (narrow) %v1386_v50, 8  ;;  %534 = vxpose.xlu2.b32.cont [8/16] (narrow) %v1392_v52, 8 }
  0x5f   : > { %333 = vxpose.xlu0.b32.cont [9/16] (narrow) %v1396_v53, 8 }
  0x62   : > { %446 = vxpose.xlu1.b32.cont [9/16] (narrow) %v1405_v58, 8  ;;  %535 = vxpose.xlu2.b32.cont [9/16] (narrow) %v1409_v60, 8 }
  0x67   : > { %334 = vxpose.xlu0.b32.cont [10/16] (narrow) %v1389_v51, 8 }
  0x6a   : > { %447 = vxpose.xlu1.b32.cont [10/16] (narrow) %v1415_v63, 8  ;;  %536 = vxpose.xlu2.b32.cont [10/16] (narrow) %v1421_v1, 8 }
  0x6f   : > { %335 = vxpose.xlu0.b32.cont [11/16] (narrow) %v1425_v2, 8 }
  0x72   : > { %448 = vxpose.xlu1.b32.cont [11/16] (narrow) %v1434_v7, 8  ;;  %537 = vxpose.xlu2.b32.cont [11/16] (narrow) %v1438_v9, 8 }
  0x77   : > { %336 = vxpose.xlu0.b32.cont [12/16] (narrow) %v1418_v0, 8 }
  0x7a   : > { %449 = vxpose.xlu1.b32.cont [12/16] (narrow) %v1444_v13, 8  ;;  %538 = vxpose.xlu2.b32.cont [12/16] (narrow) %v1450_v16, 8 }
  0x7f   : > { %337 = vxpose.xlu0.b32.cont [13/16] (narrow) %v1454_v17, 8 }
  0x82   : > { %450 = vxpose.xlu1.b32.cont [13/16] (narrow) %v1463_v28, 8  ;;  %539 = vxpose.xlu2.b32.cont [13/16] (narrow) %v1467_v30, 8 }
  0x87   : > { %338 = vxpose.xlu0.b32.cont [14/16] (narrow) %v1447_v15, 8 }
  0x8a   : > { %451 = vxpose.xlu1.b32.cont [14/16] (narrow) %v1473_v35, 8  ;;  %540 = vxpose.xlu2.b32.cont [14/16] (narrow) %v1479_v41, 8 }
  0x8f   : > { %339 = vxpose.xlu0.b32.cont [15/16] (narrow) %v1483_v42, 8 }
  0x92   : > { %452 = vxpose.xlu1.b32.cont [15/16] (narrow) %v1492_v49, 8  ;;  %541 = vxpose.xlu2.b32.cont [15/16] (narrow) %v1496_v55, 8 }
  0x97   : > { %340 = vxpose.xlu0.b32.end [16/16] (narrow) %v1476_v36, 8 }
  0x9a   : > { %453 = vxpose.xlu1.b32.end [16/16] (narrow) %v1502_v59, 8  ;;  %542 = vxpose.xlu2.b32.end [16/16] (narrow) %v1505_v61, 8 }
  0x9f   : > { %559 = vxpose.xlu0.b32.start [1/16] (narrow) %v1310_v14, 8  ;;  %v319_v14 = vld [vmem:[%s1297_s11 + $0xc0] sm:$0xff] }
  0xa2   : > { %601 = vxpose.xlu1.b32.start [1/16] (narrow) %v1318_v19, 8  ;;  %640 = vxpose.xlu2.b32.start [1/16] (narrow) %v1322_v21, 8  ;;  %v594_v19 = vrot.slane %v319_v14, 1 }
  0xa7   : > { %560 = vxpose.xlu0.b32.cont [2/16] (narrow) %v1306_v12, 8  ;;  %v1550_v12 = vld [vmem:[%s1297_s11 + $0xc8] sm:$0xff] }
  0xa8   : > { %v595_v21 = vrot.slane %v1550_v12, 1 }
  0xaa   : > { %602 = vxpose.xlu1.b32.cont [2/16] (narrow) %v1328_v24, 8  ;;  %641 = vxpose.xlu2.b32.cont [2/16] (narrow) %v1334_v26, 8  ;;  %v633_v24 = vrot.slane %v319_v14, 2  ;;  %v634_v26 = vrot.slane %v1550_v12, 2  ;;  %v596_v62 = vsel %vm381_vm0, %v594_v19, %v595_v21  ;;  %v598_v8 = vsel %vm381_vm0, %v595_v21, %v597_v5 }
  0xac   : > { %v635_v4 = vsel %vm470_vm1, %v633_v24, %v634_v26  ;;  %v637_v10 = vsel %vm470_vm1, %v634_v26, %v636_v6 }
  0xaf   : > { %561 = vxpose.xlu0.b32.cont [3/16] (narrow) %v1338_v27, 8 }
  0xb2   : > { %603 = vxpose.xlu1.b32.cont [3/16] (narrow) %v1347_v32, 8  ;;  %642 = vxpose.xlu2.b32.cont [3/16] (narrow) %v1351_v34, 8 }
  0xb7   : > { %562 = vxpose.xlu0.b32.cont [4/16] (narrow) %v1331_v25, 8 }
  0xba   : > { %604 = vxpose.xlu1.b32.cont [4/16] (narrow) %v1357_v37, 8  ;;  %643 = vxpose.xlu2.b32.cont [4/16] (narrow) %v1363_v39, 8 }
  0xbf   : > { %563 = vxpose.xlu0.b32.cont [5/16] (narrow) %v1367_v40, 8 }
  0xc2   : > { %605 = vxpose.xlu1.b32.cont [5/16] (narrow) %v1376_v45, 8  ;;  %644 = vxpose.xlu2.b32.cont [5/16] (narrow) %v1380_v47, 8 }
  0xc7   : > { %564 = vxpose.xlu0.b32.cont [6/16] (narrow) %v1360_v38, 8 }
  0xca   : > { %606 = vxpose.xlu1.b32.cont [6/16] (narrow) %v1386_v50, 8  ;;  %645 = vxpose.xlu2.b32.cont [6/16] (narrow) %v1392_v52, 8 }
  0xcf   : > { %565 = vxpose.xlu0.b32.cont [7/16] (narrow) %v1396_v53, 8 }
  0xd2   : > { %607 = vxpose.xlu1.b32.cont [7/16] (narrow) %v1405_v58, 8  ;;  %646 = vxpose.xlu2.b32.cont [7/16] (narrow) %v1409_v60, 8 }
  0xd7   : > { %566 = vxpose.xlu0.b32.cont [8/16] (narrow) %v1389_v51, 8 }
  0xda   : > { %608 = vxpose.xlu1.b32.cont [8/16] (narrow) %v1415_v63, 8  ;;  %647 = vxpose.xlu2.b32.cont [8/16] (narrow) %v1421_v1, 8 }
  0xdf   : > { %567 = vxpose.xlu0.b32.cont [9/16] (narrow) %v1425_v2, 8 }
  0xe2   : > { %609 = vxpose.xlu1.b32.cont [9/16] (narrow) %v1434_v7, 8  ;;  %648 = vxpose.xlu2.b32.cont [9/16] (narrow) %v1438_v9, 8 }
  0xe7   : > { %568 = vxpose.xlu0.b32.cont [10/16] (narrow) %v1418_v0, 8 }
  0xea   : > { %610 = vxpose.xlu1.b32.cont [10/16] (narrow) %v1444_v13, 8  ;;  %649 = vxpose.xlu2.b32.cont [10/16] (narrow) %v1450_v16, 8 }
  0xef   : > { %569 = vxpose.xlu0.b32.cont [11/16] (narrow) %v1454_v17, 8 }
  0xf2   : > { %611 = vxpose.xlu1.b32.cont [11/16] (narrow) %v1463_v28, 8  ;;  %650 = vxpose.xlu2.b32.cont [11/16] (narrow) %v1467_v30, 8 }
  0xf7   : > { %570 = vxpose.xlu0.b32.cont [12/16] (narrow) %v1447_v15, 8 }
  0xfa   : > { %612 = vxpose.xlu1.b32.cont [12/16] (narrow) %v1473_v35, 8  ;;  %651 = vxpose.xlu2.b32.cont [12/16] (narrow) %v1479_v41, 8 }
  0xff   : > { %571 = vxpose.xlu0.b32.cont [13/16] (narrow) %v1483_v42, 8 }
 0x102   : > { %613 = vxpose.xlu1.b32.cont [13/16] (narrow) %v1492_v49, 8  ;;  %652 = vxpose.xlu2.b32.cont [13/16] (narrow) %v1496_v55, 8 }
 0x107   : > { %572 = vxpose.xlu0.b32.cont [14/16] (narrow) %v1476_v36, 8 }
 0x10a   : > { %614 = vxpose.xlu1.b32.cont [14/16] (narrow) %v1502_v59, 8  ;;  %653 = vxpose.xlu2.b32.cont [14/16] (narrow) %v1505_v61, 8 }
 0x10f   : > { %573 = vxpose.xlu0.b32.cont [15/16] (narrow) %v319_v14, 8 }
 0x112   : > { %615 = vxpose.xlu1.b32.cont [15/16] (narrow) %v596_v62, 8  ;;  %654 = vxpose.xlu2.b32.cont [15/16] (narrow) %v635_v4, 8 }
 0x117   : > { %574 = vxpose.xlu0.b32.end [16/16] (narrow) %v1550_v12, 8 }
 0x11a   : > { %616 = vxpose.xlu1.b32.end [16/16] (narrow) %v598_v8, 8  ;;  %655 = vxpose.xlu2.b32.end [16/16] (narrow) %v637_v10, 8 }
 0x11f   : > { %672 = vxpose.xlu0.b32.start [1/16] (narrow) %v1338_v27, 8  ;;  %v341_v27 = vpop.trf.xlu0 }
 0x120   : > { %795 = vst [vmem:[#allocation1] ss:$2 sm:$0xff] %v341_v27 }
 0x122   : > { %753 = vxpose.xlu1.b32.start [1/16] (narrow) %v1351_v34, 8  ;;  %714 = vxpose.xlu2.b32.start [1/16] (narrow) %v1347_v32, 8  ;;  %v543_v32 = vpop.trf.xlu2 }
 0x123   : > { %799 = vst [vmem:[#allocation1 + $0x10] ss:$2 sm:$0xff] %v543_v32 }
 0x127   : > { %673 = vxpose.xlu0.b32.cont [2/16] (narrow) %v1331_v25, 8  ;;  %v454_v25 = vpop.trf.xlu1 }
 0x128   : > { %797 = vst [vmem:[#allocation1 + $0x1] ss:$2 sm:$0xff] %v454_v25 }
 0x12a   : > { %754 = vxpose.xlu1.b32.cont [2/16] (narrow) %v1363_v39, 8  ;;  %715 = vxpose.xlu2.b32.cont [2/16] (narrow) %v1357_v37, 8  ;;  %v323_v39 = vld [vmem:[%s1297_s11 + $0xe0] sm:$0xff] }
 0x12f   : > { %674 = vxpose.xlu0.b32.cont [3/16] (narrow) %v1367_v40, 8  ;;  %v322_v40 = vld [vmem:[%s1297_s11 + $0xd8] sm:$0xff] }
 0x132   : > { %755 = vxpose.xlu1.b32.cont [3/16] (narrow) %v1380_v47, 8  ;;  %716 = vxpose.xlu2.b32.cont [3/16] (narrow) %v1376_v45, 8  ;;  %v746_v45 = vrot.slane %v322_v40, 2  ;;  %v747_v47 = vrot.slane %v323_v39, 2 }
 0x137   : > { %675 = vxpose.xlu0.b32.cont [4/16] (narrow) %v1360_v38, 8 }
 0x13a   : > { %756 = vxpose.xlu1.b32.cont [4/16] (narrow) %v1392_v52, 8  ;;  %717 = vxpose.xlu2.b32.cont [4/16] (narrow) %v1386_v50, 8  ;;  %v707_v50 = vrot.slane %v322_v40, 1  ;;  %v748_v52 = vsel %vm470_vm1, %v746_v45, %v747_v47 }
 0x13b   : > { %v656_v38 = vpop.trf.xlu2 }
 0x13c   : > { %805 = vst [vmem:[#allocation1 + $0x21] ss:$2 sm:$0xff] %v656_v38 }
 0x13f   : > { %676 = vxpose.xlu0.b32.cont [5/16] (narrow) %v1396_v53, 8  ;;  %v324_v53 = vld [vmem:[%s1297_s11 + $0xe8] sm:$0x3]  ;;  %s1097_s11 = sshra.s32 %s917_s28, 4  ;;  %s1098_s11 = int_to_ptr.hbm [resolvable:$true] %s1097_s11 }
 0x140   : > { %s1099_s13 = scalar_lea.hbm %s1098_s11, 8  ;;  %p1104_p2 = scmp.lt.s32.totalorder %s1098_s11, %s1678_s7 }
 0x141   : > { %p1100_p13 = scmp.ne.s32.totalorder %s1098_s11, %s1099_s13  ;;  %p1105_p4 = scmp.lt.s32.totalorder %s1103_s18, %s1099_s13 }
 0x142   : > { %757 = vxpose.xlu1.b32.cont [5/16] (narrow) %v1409_v60, 8  ;;  %718 = vxpose.xlu2.b32.cont [5/16] (narrow) %v1405_v58, 8  ;;  %v749_v60 = vrot.slane %v324_v53, 2 }
 0x143   : > { %v575_v37 = vpop.trf.xlu0  ;;  %p1101_p0 = pnand %p1100_p13, %p1271_p3  ;;  %p1106_p5 = por %p1105_p4, %p1104_p2 }
 0x144   : > { %801 = vst [vmem:[#allocation1 + $0x11] ss:$2 sm:$0xff] %v575_v37 }
 0x145   : > { %p1102_p1 = pneg %p1101_p0 }
 0x146   : > { %v617_v34 = vpop.trf.xlu1 }
 0x147   : > { %677 = vxpose.xlu0.b32.cont [6/16] (narrow) %v1389_v51, 8  ;;  %803 = vst [vmem:[#allocation1 + $0x20] ss:$2 sm:$0xff] %v617_v34  ;;  %v708_v51 = vrot.slane %v323_v39, 1  ;;  %p1107_p6 = pnand %p1106_p5, %p1102_p1 }
 0x149   : > { %v709_v58 = vsel %vm381_vm0, %v707_v50, %v708_v51 }
 0x14a   : > { %758 = vxpose.xlu1.b32.cont [6/16] (narrow) %v1421_v1, 8  ;;  %719 = vxpose.xlu2.b32.cont [6/16] (narrow) %v1415_v63, 8  ;;  %v710_v63 = vrot.slane %v324_v53, 1 }
 0x14b   : > { %v811_v29 = vld.sshfl [vmem:[#allocation1 + $0x10] sm:$0xff pattern:$0x75316420] }
 0x14c   : > { %v711_v1 = vsel %vm381_vm0, %v708_v51, %v710_v63 }
 0x14e   : > { %v812_v20 = vld.sshfl [vmem:[#allocation1 + $0x20] sm:$0xff pattern:$0x75316420] }
 0x14f   : > { %678 = vxpose.xlu0.b32.cont [7/16] (narrow) %v1425_v2, 8  ;;  %v861_v2 = vpack.c.bf16 %v617_v34, %v617_v34 }
 0x152   : > { %759 = vxpose.xlu1.b32.cont [7/16] (narrow) %v1438_v9, 8  ;;  %720 = vxpose.xlu2.b32.cont [7/16] (narrow) %v1434_v7, 8  ;;  %v867_v9 = vsel %vm828_vm2, %v861_v2, 0 }
 0x153   : > { %876 = vmatpush.bf16.msra.mxu1 %v867_v9 }
 0x156   : > { %1001 = vmatmul.msk.bf16.vlgmr.msra.gmra.mxu1 %vm862_vm3, %v860_v11 }
 0x157   : > { %679 = vxpose.xlu0.b32.cont [8/16] (narrow) %v1418_v0, 8  ;;  %v750_v0 = vsel %vm470_vm1, %v747_v47, %v749_v60 }
 0x15a   : > { %760 = vxpose.xlu1.b32.cont [8/16] (narrow) %v1450_v16, 8  ;;  %721 = vxpose.xlu2.b32.cont [8/16] (narrow) %v1444_v13, 8 }
 0x15f   : > { %680 = vxpose.xlu0.b32.cont [9/16] (narrow) %v1454_v17, 8 }
 0x162   : > { %761 = vxpose.xlu1.b32.cont [9/16] (narrow) %v1467_v30, 8  ;;  %722 = vxpose.xlu2.b32.cont [9/16] (narrow) %v1463_v28, 8 }
 0x167   : > { %681 = vxpose.xlu0.b32.cont [10/16] (narrow) %v1447_v15, 8  ;;  %v810_v15 = vld.sshfl [vmem:[#allocation1] sm:$0xff pattern:$0x75316420] }
 0x168   : > { %v821_v30 = vpack.c.bf16 %v811_v29, %v810_v15 }
 0x16a   : > { %762 = vxpose.xlu1.b32.cont [10/16] (narrow) %v1479_v41, 8  ;;  %723 = vxpose.xlu2.b32.cont [10/16] (narrow) %v1473_v35, 8  ;;  %v853_v35 = vld [vmem:[%s1675_s4] sm:$0xff] }
 0x16b   : > { %v884_v41 = vld [vmem:[%s1676_s5] sm:$0xff] }
 0x16f   : > { %682 = vxpose.xlu0.b32.cont [11/16] (narrow) %v1483_v42, 8  ;;  %v846_v42 = vld [vmem:[%s1674_s3] sm:$0xff] }
 0x172   : > { %763 = vxpose.xlu1.b32.cont [11/16] (narrow) %v1496_v55, 8  ;;  %724 = vxpose.xlu2.b32.cont [11/16] (narrow) %v1492_v49, 8 }
 0x177   : > { %683 = vxpose.xlu0.b32.cont [12/16] (narrow) %v1476_v36, 8  ;;  %v891_v36 = vld [vmem:[%s1677_s6] sm:$0xff] }
 0x17a   : > { %764 = vxpose.xlu1.b32.cont [12/16] (narrow) %v1505_v61, 8  ;;  %725 = vxpose.xlu2.b32.cont [12/16] (narrow) %v1502_v59, 8 }
 0x17f   : > { %684 = vxpose.xlu0.b32.cont [13/16] (narrow) %v319_v14, 8 }
 0x182   : > { %765 = vxpose.xlu1.b32.cont [13/16] (narrow) %v635_v4, 8  ;;  %726 = vxpose.xlu2.b32.cont [13/16] (narrow) %v596_v62, 8 }
 0x187   : > { %685 = vxpose.xlu0.b32.cont [14/16] (narrow) %v1550_v12, 8 }
 0x18a   : > { %766 = vxpose.xlu1.b32.cont [14/16] (narrow) %v637_v10, 8  ;;  %727 = vxpose.xlu2.b32.cont [14/16] (narrow) %v598_v8, 8 }
 0x18f   : > { %686 = vxpose.xlu0.b32.cont [15/16] (narrow) %v322_v40, 8 }
 0x192   : > { %767 = vxpose.xlu1.b32.cont [15/16] (narrow) %v748_v52, 8  ;;  %728 = vxpose.xlu2.b32.cont [15/16] (narrow) %v709_v58, 8 }
 0x197   : > { %687 = vxpose.xlu0.b32.end [16/16] (narrow) %v323_v39, 8 }
 0x19a   : > { %768 = vxpose.xlu1.b32.end [16/16] (narrow) %v750_v0, 8  ;;  %729 = vxpose.xlu2.b32.end [16/16] (narrow) %v711_v1, 8 }
 0x1bb   : > { %v730_v7 = vpop.trf.xlu2 }
 0x1bc   : > { %809 = vst [vmem:[#allocation1 + $0x31] ss:$2 sm:$0xff] %v730_v7 }
 0x1c3   : > { %v688_v13 = vpop.trf.xlu0 }
 0x1c4   : > { %807 = vst [vmem:[#allocation1 + $0x30] ss:$2 sm:$0xff] %v688_v13 }
 0x1c6   : > { %v769_v16 = vpop.trf.xlu1 }
 0x1c7   : > { %814 = vst [vmem:[#allocation1] ss:$2 sm:$0xff] %v769_v16 }
 0x1cb   : > { %v813_v22 = vld.sshfl [vmem:[#allocation1 + $0x30] sm:$0xff pattern:$0x75316420] }
 0x1cc   : > { %v822_v28 = vpack.c.bf16 %v813_v22, %v812_v20 }
 0x1ce   : > { %v815_v17 = vld.sshfl [vmem:[#allocation1] sm:$0xff pattern:$0x75316420] }
 0x1cf   : > { %v823_v18 = vpack.c.bf16 %v815_v17, %v815_v17 }
 0x1d1   : > { %v830_v23 = vsel %vm828_vm2, %v823_v18, 0 }
 0x1d2   : > { %837 = vmatpush.bf16.msra.mxu0 %v830_v23 }
 0x1d3   : > { %v878_v43 = vpop.f32.mrf.mxu1 }
 0x1d6   : > { %838 = vmatpush.bf16.msra.mxu0 %v822_v28 }
 0x1da   : > { %839 = vmatpush.bf16.msra.mxu0 %v821_v30 }
 0x1db   : > { %v880_v44 = vpop.f32.mrf.mxu1 }
 0x1dd   : > { %1000 = vmatmul.msk.bf16.vlgmr.msra.gmra.mxu0 %vm824_vm4, %v785_v31 }
 0x1ed   : > { %1081 = vset.pattern.permute.xlu1 %v1179_v33 }
 0x1f4   : > { %856 = vperm.xlu1 %1081, %v853_v35  }
 0x1fc   : > { %894 = vperm.xlu1 %1081, %v891_v36   ;;  %1082 = vset.pattern.permute.xlu2 %v1179_v33 }
 0x1fe   : > { %1080 = vset.pattern.permute.xlu0 %v1179_v33 }
 0x203   : > { %887 = vperm.xlu2 %1082, %v884_v41  }
 0x205   : > { %849 = vperm.xlu0 %1080, %v846_v42  }
 0x25a   : > { %v841_v46 = vpop.f32.mrf.mxu0 }
 0x25b   : > { %v845_v49 = vmax.f32 %v841_v46, 0.0 }
 0x25d   : > { %v888_v61 = vpop.permute.xlu2 %887 }
 0x262   : > { %v843_v48 = vpop.f32.mrf.mxu0 }
 0x266   : > { %v857_v54 = vpop.permute.xlu1 %856 }
 0x26e   : > { %v895_v19 = vpop.permute.xlu1 %894 }
 0x277   : > { %v850_v55 = vpop.permute.xlu0 %849 }
 0x278   : > { %v852_v56 = vmul.f32 %v850_v55, %v845_v49 }
 0x27a   : > { %v859_v57 = vadd.f32 %v857_v54, %v852_v56 }
 0x27c   : > { %v882_v59 = vadd.f32 %v878_v43, %v859_v57 }
 0x27e   : > { %v883_v12 = vmax.f32 %v882_v59, 0.0 }
 0x280   : > { %v890_v14 = vmul.f32 %v888_v61, %v883_v12 }
 0x282   : > { %v897_v21 = vadd.f32 %v895_v19, %v890_v14 }
 0x284   : > { %898 = vst [vmem:[%s285_s9] sm:$0xff] %v897_v21 }
 0x285   : > { %1110 = shalt.err (!%p1107_p6)
}
 0x286   : > { %1008 = dma.vmem_to_hbm [thread:$0]  (%p1271_p3), %s915_s10, 128, %s917_s28, %s900_s27  }
 0x287 PF: > { %p1014_p7 = scmp.ge.s32.totalorder %s1177_s8, 2  ;;  %s928_s16 = sand.u32 1, %s1149_s24  }
 0x288   : > { %s929_s23 = scalar_lea.sflag [#allocation3], %s928_s16 }
 0x289   : > { %p1011_p9 = pnand %p1014_p7, %p1280_p8 }
 0x28b   : > { %p1012_p10 = pneg %p1011_p9 }
 0x28d   : > { %1144 = dma.done.wait (%p1012_p10), %s929_s23, 128  }
 0x28e   : > { %1146 = vsyncadd (%p1012_p10), %s929_s23, 4294967168  ;;  %s20_s8 = sadd.s32 1, %s1177_s8   ;;  %s1683_s14 = sld [smem:[#allocation5_spill]] }
 0x28f   : > { %p17_p11 = scmp.ge.s32.totalorder %s20_s8, 6   ;;  %s1684_s24 = smov %s1153_s25 }
 0x290   : > { %s1685_s25 = smov %s1157_s26  ;;  %s1686_s26 = smov %s1289_s19 }
 0x291   : > { %s1687_s27 = smov %s1169_s29  ;;  %s1688_s28 = smov %s1173_s30 }
 0x292   : > { %s1690_s30 = smov %s1696_s12  ;;  %19 = sbr.rel (!%p17_p11) target bundleno = 5 (0x5), region = 91 }
 0x294   : > { %s1689_s29 = smov %s1683_s14 }
 0x297   :  { %935 = vsyncpa [#allocation3], 1 }
 0x298   :  { %937 = vsyncpa [#allocation3 + $0x1], 1 }

</bundles_post_ra>
